<compile_context>
chip_gen: v5e
topology: v5e:2x2
jax: 0.10.0
libtpu: 0.0.40
codegen_flags: <defaults>
</compile_context>

<pallas_src>
import functools

import jax
import jax.numpy as jnp
from jax import lax
from jax.experimental import pallas as pl
from jax.experimental.pallas import tpu as pltpu


# "epsilon" clamp constant of the original repo (module-level global); only
# matters for windows whose probability mass underflows to zero.
EPSILON = 1e-30


def num_pad_from_symb_pad(pad, ksize):
    if pad == "same":
        return ((ksize - 1) // 2, (ksize - 1) // 2)
    elif pad == "valid":
        return (0, 0)
    elif isinstance(pad, tuple):
        return pad
    else:
        raise ValueError(f"Padding is unknown--Pad: {pad}")


def _round_up(a, b):
    return -(-a // b) * b


def _padded_tile_bytes(shape, itemsize):
    """Approximate VMEM footprint of a tile under (8, 128) tiling."""
    lead = 1
    for d in shape[:-2]:
        lead *= d
    return lead * _round_up(shape[-2], 8) * _round_up(max(shape[-1], 1), 128) * itemsize


def _kl_avg_pool_kernel(x_ref, o_ref, epad_ref, colsum_ref, *,
                        k, s, pr, pc, H, W, Ho, Wo, eps):
    """Probability-space average pooling of one (H, W, F) plane.

    x_ref:      (H, W, F)        log-probabilities (input dtype)
    o_ref:      (Ho, Wo, F)      pooled log-probabilities (input dtype)
    epad_ref:   (H, W + 2*pc, F) f32 scratch: exp(x), zero W-padding baked in
    colsum_ref: (Wo, H + 2*pr, F) f32 scratch: per-input-row W-window sums,
                zero H-padding rows baked in.
    """
    # ---- stage 0: exp once per element (f32), zero-padded along W ----------
    epad_ref[...] = jnp.zeros_like(epad_ref)
    epad_ref[:, pc:pc + W, :] = jnp.exp(x_ref[...].astype(jnp.float32))

    # ---- stage A: 1-D sliding-window sums along W ---------------------------
    colsum_ref[...] = jnp.zeros_like(colsum_ref)

    def col_body(ow, carry):
        win = epad_ref[:, pl.ds(ow * s, k), :]               # (H, k, F)
        colsum_ref[ow, pr:pr + H, :] = jnp.sum(win, axis=1)  # (H, F)
        return carry

    lax.fori_loop(0, Wo, col_body, 0)

    # ---- per-output-column valid counts (count_include_pad=False) ----------
    c0 = lax.broadcasted_iota(jnp.int32, (Wo, 1), 0) * s - pc          # (Wo, 1)
    ncol = jnp.maximum(jnp.minimum(c0 + k, W) - jnp.maximum(c0, 0), 0)
    ncol_f = ncol.astype(jnp.float32)

    # ---- stage B: 1-D sums along H, normalize, clamp, log -------------------
    def row_body(oh, carry):
        ssum = jnp.sum(colsum_ref[:, pl.ds(oh * s, k), :], axis=1)     # (Wo, F)
        r0 = oh * s - pr
        nrow = jnp.maximum(jnp.minimum(r0 + k, H) - jnp.maximum(r0, 0), 0)
        cnt = ncol_f * nrow.astype(jnp.float32)                        # (Wo, 1)
        avg = ssum / cnt
        o_ref[oh] = jnp.log(jnp.maximum(avg, eps)).astype(o_ref.dtype)
        return carry

    lax.fori_loop(0, Ho, row_body, 0)


def kl_avg_pool(x, spsize, stride, pad="same", *, epsilon=EPSILON):
    """KLAvgPool.forward: x (N, C, H, W, F) -> (N, C, Ho, Wo, F)."""
    N, C, H, W, F = x.shape
    k, s = int(spsize), int(stride)
    pr, pc = num_pad_from_symb_pad(pad, k)
    Ho = (H + 2 * pr - k) // s + 1
    Wo = (W + 2 * pc - k) // s + 1
    Hw, Wp = H + 2 * pr, W + 2 * pc
    NC = N * C

    x2 = x.reshape(NC, H, W, F)          # free: collapses leading dims only
    itemsize = jnp.dtype(x.dtype).itemsize

    kernel = functools.partial(
        _kl_avg_pool_kernel,
        k=k, s=s, pr=pr, pc=pc, H=H, W=W, Ho=Ho, Wo=Wo, eps=float(epsilon))

    # VMEM budget: double-buffered in/out tiles + the two f32 scratches.
    vmem_est = (2 * _padded_tile_bytes((H, W, F), itemsize)
                + 2 * _padded_tile_bytes((Ho, Wo, F), itemsize)
                + _padded_tile_bytes((H, Wp, F), 4)
                + _padded_tile_bytes((Wo, Hw, F), 4)
                + (4 << 20))
    vmem_limit = int(min(max(vmem_est, 16 << 20), 48 << 20))

    out = pl.pallas_call(
        kernel,
        out_shape=jax.ShapeDtypeStruct((NC, Ho, Wo, F), x.dtype),
        grid_spec=pltpu.PrefetchScalarGridSpec(
            num_scalar_prefetch=0,
            grid=(NC,),
            in_specs=[pl.BlockSpec((None, H, W, F), lambda p: (p, 0, 0, 0))],
            out_specs=pl.BlockSpec((None, Ho, Wo, F), lambda p: (p, 0, 0, 0)),
            scratch_shapes=[
                pltpu.VMEM((H, Wp, F), jnp.float32),
                pltpu.VMEM((Wo, Hw, F), jnp.float32),
            ],
        ),
        compiler_params=pltpu.CompilerParams(
            dimension_semantics=("parallel",),
            vmem_limit_bytes=vmem_limit,
        ),
    )(x2)

    return out.reshape(N, C, Ho, Wo, F)


def _reference(x, spsize, stride, pad, epsilon=EPSILON):
    """Pure-JAX reference: exp -> avg_pool2d(count_include_pad=False) -> clamp -> log."""
    N, C, H, W, F = x.shape
    pr, pc = num_pad_from_symb_pad(pad, spsize)
    k, s = spsize, stride
    e = jnp.exp(x.astype(jnp.float32))
    ssum = jax.lax.reduce_window(
        e, 0.0, jax.lax.add,
        window_dimensions=(1, 1, k, k, 1),
        window_strides=(1, 1, s, s, 1),
        padding=((0, 0), (0, 0), (pr, pr), (pc, pc), (0, 0)),
    )
    Ho, Wo = ssum.shape[2], ssum.shape[3]
    ru = jnp.arange(Ho)[:, None] * s - pr + jnp.arange(k)[None, :]
    cu = jnp.arange(Wo)[:, None] * s - pc + jnp.arange(k)[None, :]
    nrow = jnp.sum((ru >= 0) & (ru < H), axis=1)
    ncol = jnp.sum((cu >= 0) & (cu < W), axis=1)
    count = (nrow[:, None] * ncol[None, :]).astype(jnp.float32)
    avg = ssum / count[None, None, :, :, None]
    return jnp.log(jnp.maximum(avg, epsilon)).astype(x.dtype)


if __name__ == "__main__":
    key = jax.random.PRNGKey(0)
    # Small 5-D input consistent with the module layout (N, C, H, W, F).
    N, C, H, W, F = 2, 4, 16, 16, 4
    spsize, stride, pad = 3, 2, "same"
    x = jax.random.normal(key, (N, C, H, W, F), dtype=jnp.float32)

    out = kl_avg_pool(x, spsize, stride, pad)
    out = jax.block_until_ready(out)

    ref = _reference(x, spsize, stride, pad)
    assert out.shape == ref.shape, (out.shape, ref.shape)
    assert jnp.allclose(out, ref, atol=2e-5, rtol=2e-5), float(
        jnp.max(jnp.abs(out - ref))
    )

    print("KERNEL_OK")
</pallas_src>

<mosaic_0001>
module attributes {stable_mosaic.version = 11 : i64} {
  func.func @_kl_avg_pool_kernel(%arg0: i32, %arg1: memref<1x16x16x4xf32, #tpu.memory_space<vmem>>, %arg2: memref<1x8x8x4xf32, #tpu.memory_space<vmem>>, %arg3: memref<16x18x4xf32, #tpu.memory_space<vmem>>, %arg4: memref<8x18x4xf32, #tpu.memory_space<vmem>>) attributes {dimension_semantics = [#tpu.dimension_semantics<parallel>], iteration_bounds = array<i64: 8>, scalar_prefetch = 0 : i64, scratch_operands = 2 : i64, tpu.core_type = #tpu.core_type<tc>, window_params = [{transform_indices = @transform_0, window_bounds = array<i64: 1, 16, 16, 4>}, {transform_indices = @transform_1, window_bounds = array<i64: 1, 8, 8, 4>}]} {
    %cst = arith.constant 0.000000e+00 : f32
    %0 = vector.broadcast %cst : f32 to vector<16x18x4xf32>
    %c0 = arith.constant 0 : index
    %c0_0 = arith.constant 0 : index
    %c0_1 = arith.constant 0 : index
    %1 = vector.load %arg3[%c0, %c0_0, %c0_1] : memref<16x18x4xf32, #tpu.memory_space<vmem>>, vector<16x18x4xf32>
    tpu.vector_store %arg3[%c0, %c0_0, %c0_1], %0 {strides = array<i32>} : memref<16x18x4xf32, #tpu.memory_space<vmem>>, vector<16x18x4xf32>,
    %c0_2 = arith.constant 0 : index
    %c0_3 = arith.constant 0 : index
    %c0_4 = arith.constant 0 : index
    %c0_5 = arith.constant 0 : index
    %2 = vector.load %arg1[%c0_2, %c0_3, %c0_4, %c0_5] : memref<1x16x16x4xf32, #tpu.memory_space<vmem>>, vector<1x16x16x4xf32>
    %3 = vector.shape_cast %2 : vector<1x16x16x4xf32> to vector<16x16x4xf32>
    %4 = math.exp %3 : vector<16x16x4xf32>
    %c0_6 = arith.constant 0 : index
    %c1 = arith.constant 1 : index
    %c0_7 = arith.constant 0 : index
    %5 = vector.load %arg3[%c0_6, %c1, %c0_7] : memref<16x18x4xf32, #tpu.memory_space<vmem>>, vector<16x16x4xf32>
    tpu.vector_store %arg3[%c0_6, %c1, %c0_7], %4 {strides = array<i32>} : memref<16x18x4xf32, #tpu.memory_space<vmem>>, vector<16x16x4xf32>,
    %cst_8 = arith.constant 0.000000e+00 : f32
    %6 = vector.broadcast %cst_8 : f32 to vector<8x18x4xf32>
    %c0_9 = arith.constant 0 : index
    %c0_10 = arith.constant 0 : index
    %c0_11 = arith.constant 0 : index
    %7 = vector.load %arg4[%c0_9, %c0_10, %c0_11] : memref<8x18x4xf32, #tpu.memory_space<vmem>>, vector<8x18x4xf32>
    tpu.vector_store %arg4[%c0_9, %c0_10, %c0_11], %6 {strides = array<i32>} : memref<8x18x4xf32, #tpu.memory_space<vmem>>, vector<8x18x4xf32>,
    %c0_i32 = arith.constant 0 : i32
    %c8_i32 = arith.constant 8 : i32
    %8 = arith.addi %c0_i32, %c8_i32 : i32
    %c1_i32 = arith.constant 1 : i32
    scf.for %arg5 = %c0_i32 to %8 step %c1_i32  : i32 {
      %c2_i32_20 = arith.constant 2 : i32
      %25 = arith.muli %arg5, %c2_i32_20 : i32
      %c0_21 = arith.constant 0 : index
      %26 = arith.index_cast %25 : i32 to index
      %c0_22 = arith.constant 0 : index
      %27 = vector.load %arg3[%c0_21, %26, %c0_22] : memref<16x18x4xf32, #tpu.memory_space<vmem>>, vector<16x3x4xf32>
      %cst_23 = arith.constant dense<0.000000e+00> : vector<16x4xf32>
      %28 = vector.multi_reduction <add>, %27, %cst_23 [1] : vector<16x3x4xf32> to vector<16x4xf32>
      %29 = arith.index_cast %arg5 : i32 to index
      %c1_24 = arith.constant 1 : index
      %c0_25 = arith.constant 0 : index
      %30 = vector.load %arg4[%29, %c1_24, %c0_25] : memref<8x18x4xf32, #tpu.memory_space<vmem>>, vector<1x16x4xf32>
      %31 = vector.shape_cast %30 : vector<1x16x4xf32> to vector<16x4xf32>
      %32 = vector.shape_cast %28 : vector<16x4xf32> to vector<1x16x4xf32>
      tpu.vector_store %arg4[%29, %c1_24, %c0_25], %32 {strides = array<i32>} : memref<8x18x4xf32, #tpu.memory_space<vmem>>, vector<1x16x4xf32>,
    }
    %c8_i32_12 = arith.constant 8 : i32
    %9 = tpu.iota {dimensions = array<i32: 0>} : vector<8x1xi32>
    %c2_i32 = arith.constant 2 : i32
    %10 = vector.broadcast %c2_i32 : i32 to vector<8x1xi32>
    %11 = arith.muli %9, %10 : vector<8x1xi32>
    %c1_i32_13 = arith.constant 1 : i32
    %12 = vector.broadcast %c1_i32_13 : i32 to vector<8x1xi32>
    %13 = arith.subi %11, %12 : vector<8x1xi32>
    %c3_i32 = arith.constant 3 : i32
    %14 = vector.broadcast %c3_i32 : i32 to vector<8x1xi32>
    %15 = arith.addi %13, %14 : vector<8x1xi32>
    %c16_i32 = arith.constant 16 : i32
    %16 = vector.broadcast %c16_i32 : i32 to vector<8x1xi32>
    %17 = arith.minsi %15, %16 : vector<8x1xi32>
    %c0_i32_14 = arith.constant 0 : i32
    %18 = vector.broadcast %c0_i32_14 : i32 to vector<8x1xi32>
    %19 = arith.maxsi %13, %18 : vector<8x1xi32>
    %20 = arith.subi %17, %19 : vector<8x1xi32>
    %c0_i32_15 = arith.constant 0 : i32
    %21 = vector.broadcast %c0_i32_15 : i32 to vector<8x1xi32>
    %22 = arith.maxsi %20, %21 : vector<8x1xi32>
    %23 = arith.sitofp %22 : vector<8x1xi32> to vector<8x1xf32>
    %c0_i32_16 = arith.constant 0 : i32
    %c8_i32_17 = arith.constant 8 : i32
    %24 = arith.addi %c0_i32_16, %c8_i32_17 : i32
    %c1_i32_18 = arith.constant 1 : i32
    scf.for %arg5 = %c0_i32_16 to %24 step %c1_i32_18  : i32 {
      %c2_i32_20 = arith.constant 2 : i32
      %25 = arith.muli %arg5, %c2_i32_20 : i32
      %c0_21 = arith.constant 0 : index
      %26 = arith.index_cast %25 : i32 to index
      %c0_22 = arith.constant 0 : index
      %27 = vector.load %arg4[%c0_21, %26, %c0_22] : memref<8x18x4xf32, #tpu.memory_space<vmem>>, vector<8x3x4xf32>
      %cst_23 = arith.constant dense<0.000000e+00> : vector<8x4xf32>
      %28 = vector.multi_reduction <add>, %27, %cst_23 [1] : vector<8x3x4xf32> to vector<8x4xf32>
      %c2_i32_24 = arith.constant 2 : i32
      %29 = arith.muli %arg5, %c2_i32_24 : i32
      %c1_i32_25 = arith.constant 1 : i32
      %30 = arith.subi %29, %c1_i32_25 : i32
      %c3_i32_26 = arith.constant 3 : i32
      %31 = arith.addi %30, %c3_i32_26 : i32
      %c16_i32_27 = arith.constant 16 : i32
      %32 = arith.minsi %31, %c16_i32_27 : i32
      %c0_i32_28 = arith.constant 0 : i32
      %33 = arith.maxsi %30, %c0_i32_28 : i32
      %34 = arith.subi %32, %33 : i32
      %c0_i32_29 = arith.constant 0 : i32
      %35 = arith.maxsi %34, %c0_i32_29 : i32
      %36 = arith.sitofp %35 : i32 to f32
      %37 = vector.broadcast %36 : f32 to vector<8x1xf32>
      %38 = arith.mulf %23, %37 : vector<8x1xf32>
      %39 = vector.broadcast %38 : vector<8x1xf32> to vector<8x4xf32>
      %40 = arith.divf %28, %39 : vector<8x4xf32>
      %cst_30 = arith.constant 1.000000e-30 : f32
      %41 = vector.broadcast %cst_30 : f32 to vector<8x4xf32>
      %42 = arith.maximumf %40, %41 : vector<8x4xf32>
      %43 = math.log %42 : vector<8x4xf32>
      %c0_31 = arith.constant 0 : index
      %44 = arith.index_cast %arg5 : i32 to index
      %c0_32 = arith.constant 0 : index
      %c0_33 = arith.constant 0 : index
      %45 = vector.load %arg2[%c0_31, %44, %c0_32, %c0_33] : memref<1x8x8x4xf32, #tpu.memory_space<vmem>>, vector<1x1x8x4xf32>
      %46 = vector.shape_cast %45 : vector<1x1x8x4xf32> to vector<8x4xf32>
      %47 = vector.shape_cast %43 : vector<8x4xf32> to vector<1x1x8x4xf32>
      tpu.vector_store %arg2[%c0_31, %44, %c0_32, %c0_33], %47 {strides = array<i32>} : memref<1x8x8x4xf32, #tpu.memory_space<vmem>>, vector<1x1x8x4xf32>,
    }
    %c8_i32_19 = arith.constant 8 : i32
    return
  }
  func.func @transform_0(%arg0: i32) -> (i32, i32, i32, i32) {
    %c0_i32 = arith.constant 0 : i32
    %c0_i32_0 = arith.constant 0 : i32
    %c0_i32_1 = arith.constant 0 : i32
    %c0_i32_2 = arith.constant 0 : i32
    return %arg0, %c0_i32, %c0_i32_0, %c0_i32_1 : i32, i32, i32, i32
  }
  func.func @transform_1(%arg0: i32) -> (i32, i32, i32, i32) {
    %c0_i32 = arith.constant 0 : i32
    %c0_i32_0 = arith.constant 0 : i32
    %c0_i32_1 = arith.constant 0 : i32
    %c0_i32_2 = arith.constant 0 : i32
    return %arg0, %c0_i32, %c0_i32_0, %c0_i32_1 : i32, i32, i32, i32
  }
}

</mosaic_0001>

<bundles_post_ra>
// kernel: tpu_custom_call.1
= control target key start
LH: loop header
LB: loop body
LE: loop exit
PB: predicated region body
PF: predicated region fallthrough
CT: control target
= control target key end

     0   :  { %s1039_s6 = smov 0   ;;  %s1578_s0 = inlined_call_operand.vmem [shape: f32[8,16,16,4], index: 0, kind: input, shape index: {}]   ;;  %s1579_s1 = inlined_call_operand.vmem [shape: f32[8,8,8,4], index: 1, kind: output, shape index: {}]  }
   0x1 LB: > { %s863_s7 = sadd.s32 4294967295, %s1018_s6   ;;  %p867_p0 = scmp.ge.s32.totalorder %s1018_s6, 1  ;;  %s1018_s6 = sphi %s1039_s6, %s11_s6  }
   0x2   : > { %p87_p1 = scmp.lt.s32.totalorder %s1018_s6, 9 }
   0x4   : > { %p88_p2 = pnand %p867_p0, %p87_p1 }
   0x5   : > { %p107_p3 = scmp.lt.s32.totalorder (!%p88_p2), %s863_s7, 7  ;;  %s1269_s16 = smov (!%p88_p2), 0  }
   0x6   : > { %91 = sbr.rel (%p88_p2) target bundleno = 245 (0xf5), region = 24 }
   0xb   : > { %vm1581_vm0 = vcmask 31744   ;;  %v1028_v0 = vmov 0.0   ;;  %s1627_s7 = smov (!%p107_p3, %s863_s7), 7  ;;  %vm120_vm1 = vcmask 25600  }
   0xc   : > { %118 = vst.msk [vmem:[#allocation2] sm:$0xff] %vm1581_vm0, %v1028_v0  ;;  %s882_s8 = sshll.u32 %s1627_s7, 6  ;;  %s881_s12 = sshll.u32 %s1627_s7, 8 }
   0xd   : > { %119 = vst.msk [vmem:[#allocation2 + $0x8] sm:$0xff] %vm1581_vm0, %v1028_v0  ;;  %s1063_s11 = scalar_lea.vmem %s1579_s1, %s882_s8  ;;  %s1167_s15 = scalar_lea.vmem %s1578_s0, %s881_s12 }
   0xe   : > { %122 = vst.msk [vmem:[#allocation2 + $0x18] sm:$0xff] %vm1581_vm0, %v1028_v0  ;;  %v167_v1 = vld [vmem:[%s1167_s15] sm:$0xff]  ;;  %v168_v2 = vld [vmem:[%s1167_s15 + $0x8] sm:$0xff]  ;;  %v169_v3 = vld [vmem:[%s1167_s15 + $0x10] sm:$0xff] }
   0xf   : > { %123 = vst.msk [vmem:[#allocation2 + $0x20] sm:$0xff] %vm1581_vm0, %v1028_v0  ;;  %v199_v4 = vmul.f32 1.442695, %v167_v1  ;;  %v170_v5 = vld [vmem:[%s1167_s15 + $0x18] sm:$0xff]  ;;  %v201_v6 = vmul.f32 1.442695, %v168_v2 }
  0x10   : > { %125 = vst.msk [vmem:[#allocation2 + $0x30] sm:$0xff] %vm1581_vm0, %v1028_v0  ;;  %v171_v7 = vld [vmem:[%s1167_s15 + $0x20] sm:$0xff]  ;;  %v203_v8 = vmul.f32 1.442695, %v169_v3  ;;  %v172_v9 = vld [vmem:[%s1167_s15 + $0x28] sm:$0xff]  ;;  %v173_v11 = vld [vmem:[%s1167_s15 + $0x30] sm:$0xff] }
  0x11   : > { %126 = vst.msk [vmem:[#allocation2 + $0x38] sm:$0xff] %vm1581_vm0, %v1028_v0  ;;  %v205_v10 = vmul.f32 1.442695, %v170_v5  ;;  %908 = vpow2.f32 %v199_v4  ;;  %v207_v12 = vmul.f32 1.442695, %v171_v7  ;;  %v174_v13 = vld [vmem:[%s1167_s15 + $0x38] sm:$0xff] }
  0x12   : > { %128 = vst.msk [vmem:[#allocation2 + $0x48] sm:$0xff] %vm1581_vm0, %v1028_v0  ;;  %910 = vpow2.f32 %v201_v6  ;;  %v209_v14 = vmul.f32 1.442695, %v172_v9  ;;  %v175_v15 = vld [vmem:[%s1167_s15 + $0x40] sm:$0xff]  ;;  %v211_v16 = vmul.f32 1.442695, %v173_v11 }
  0x13   : > { %129 = vst.msk [vmem:[#allocation2 + $0x50] sm:$0xff] %vm1581_vm0, %v1028_v0  ;;  %912 = vpow2.f32 %v203_v8  ;;  %v176_v17 = vld [vmem:[%s1167_s15 + $0x48] sm:$0xff]  ;;  %v213_v18 = vmul.f32 1.442695, %v174_v13  ;;  %v177_v19 = vld [vmem:[%s1167_s15 + $0x50] sm:$0xff]  ;;  %v178_v21 = vld [vmem:[%s1167_s15 + $0x58] sm:$0xff] }
  0x14   : > { %131 = vst.msk [vmem:[#allocation2 + $0x60] sm:$0xff] %vm1581_vm0, %v1028_v0  ;;  %914 = vpow2.f32 %v205_v10  ;;  %v215_v20 = vmul.f32 1.442695, %v175_v15  ;;  %v217_v22 = vmul.f32 1.442695, %v176_v17  ;;  %v179_v23 = vld [vmem:[%s1167_s15 + $0x60] sm:$0xff] }
  0x15   : > { %132 = vst.msk [vmem:[#allocation2 + $0x68] sm:$0xff] %vm1581_vm0, %v1028_v0  ;;  %916 = vpow2.f32 %v207_v12  ;;  %v219_v25 = vmul.f32 1.442695, %v177_v19  ;;  %v180_v26 = vld [vmem:[%s1167_s15 + $0x68] sm:$0xff]  ;;  %v221_v28 = vmul.f32 1.442695, %v178_v21 }
  0x16   : > { %134 = vst.msk [vmem:[#allocation2 + $0x78] sm:$0xff] %vm1581_vm0, %v1028_v0  ;;  %918 = vpow2.f32 %v209_v14  ;;  %v181_v29 = vld [vmem:[%s1167_s15 + $0x70] sm:$0xff]  ;;  %v223_v31 = vmul.f32 1.442695, %v179_v23  ;;  %v182_v32 = vld [vmem:[%s1167_s15 + $0x78] sm:$0xff]  ;;  %v183_v35 = vld [vmem:[%s1167_s15 + $0x80] sm:$0xff] }
  0x17   : > { %135 = vst.msk [vmem:[#allocation2 + $0x80] sm:$0xff] %vm1581_vm0, %v1028_v0  ;;  %v909_v24 = vpop.eup %908  ;;  %920 = vpow2.f32 %v211_v16  ;;  %v225_v34 = vmul.f32 1.442695, %v180_v26  ;;  %v227_v37 = vmul.f32 1.442695, %v181_v29  ;;  %v184_v38 = vld [vmem:[%s1167_s15 + $0x88] sm:$0xff] }
  0x18   : > { %137 = vst.msk [vmem:[#allocation2 + $0x90] sm:$0xff] %vm1581_vm0, %v1028_v0  ;;  %v911_v27 = vpop.eup %910  ;;  %922 = vpow2.f32 %v213_v18  ;;  %v229_v40 = vmul.f32 1.442695, %v182_v32  ;;  %v185_v41 = vld [vmem:[%s1167_s15 + $0x90] sm:$0xff]  ;;  %v231_v43 = vmul.f32 1.442695, %v183_v35 }
  0x19   : > { %138 = vst.msk [vmem:[#allocation2 + $0x98] sm:$0xff] %vm1581_vm0, %v1028_v0  ;;  %v913_v30 = vpop.eup %912  ;;  %924 = vpow2.f32 %v215_v20  ;;  %v186_v44 = vld [vmem:[%s1167_s15 + $0x98] sm:$0xff]  ;;  %v233_v46 = vmul.f32 1.442695, %v184_v38  ;;  %v187_v47 = vld [vmem:[%s1167_s15 + $0xa0] sm:$0xff]  ;;  %v188_v50 = vld [vmem:[%s1167_s15 + $0xa8] sm:$0xff] }
  0x1a   : > { %140 = vst.msk [vmem:[#allocation2 + $0xa8] sm:$0xff] %vm1581_vm0, %v1028_v0  ;;  %v915_v33 = vpop.eup %914  ;;  %926 = vpow2.f32 %v217_v22  ;;  %v235_v49 = vmul.f32 1.442695, %v185_v41  ;;  %v237_v52 = vmul.f32 1.442695, %v186_v44  ;;  %v189_v53 = vld [vmem:[%s1167_s15 + $0xb0] sm:$0xff] }
  0x1b   : > { %141 = vst.msk [vmem:[#allocation2 + $0xb0] sm:$0xff] %vm1581_vm0, %v1028_v0  ;;  %v917_v36 = vpop.eup %916  ;;  %928 = vpow2.f32 %v219_v25  ;;  %v239_v55 = vmul.f32 1.442695, %v187_v47  ;;  %v190_v56 = vld [vmem:[%s1167_s15 + $0xb8] sm:$0xff]  ;;  %v241_v58 = vmul.f32 1.442695, %v188_v50 }
  0x1c   : > { %143 = vst.msk [vmem:[#allocation2 + $0xc0] sm:$0xff] %vm1581_vm0, %v1028_v0  ;;  %v919_v39 = vpop.eup %918  ;;  %930 = vpow2.f32 %v221_v28  ;;  %v191_v59 = vld [vmem:[%s1167_s15 + $0xc0] sm:$0xff]  ;;  %v243_v61 = vmul.f32 1.442695, %v189_v53  ;;  %v192_v62 = vld [vmem:[%s1167_s15 + $0xc8] sm:$0xff]  ;;  %v193_v1 = vld [vmem:[%s1167_s15 + $0xd0] sm:$0xff] }
  0x1d   : > { %144 = vst.msk [vmem:[#allocation2 + $0xc8] sm:$0xff] %vm1581_vm0, %v1028_v0  ;;  %v921_v42 = vpop.eup %920  ;;  %932 = vpow2.f32 %v223_v31  ;;  %v247_v3 = vmul.f32 1.442695, %v191_v59  ;;  %v194_v4 = vld [vmem:[%s1167_s15 + $0xd8] sm:$0xff]  ;;  %v249_v6 = vmul.f32 1.442695, %v192_v62 }
  0x1e   : > { %146 = vst.msk [vmem:[#allocation2 + $0xd8] sm:$0xff] %vm1581_vm0, %v1028_v0  ;;  %v923_v45 = vpop.eup %922  ;;  %934 = vpow2.f32 %v225_v34  ;;  %v195_v7 = vld [vmem:[%s1167_s15 + $0xe0] sm:$0xff]  ;;  %v251_v9 = vmul.f32 1.442695, %v193_v1  ;;  %v196_v10 = vld [vmem:[%s1167_s15 + $0xe8] sm:$0xff]  ;;  %v197_v13 = vld [vmem:[%s1167_s15 + $0xf0] sm:$0xff] }
  0x1f   : > { %147 = vst.msk [vmem:[#allocation2 + $0xe0] sm:$0xff] %vm1581_vm0, %v1028_v0  ;;  %v925_v48 = vpop.eup %924  ;;  %936 = vpow2.f32 %v227_v37  ;;  %v253_v12 = vmul.f32 1.442695, %v194_v4  ;;  %v255_v15 = vmul.f32 1.442695, %v195_v7  ;;  %v198_v16 = vld [vmem:[%s1167_s15 + $0xf8] sm:$0xff] }
  0x20   : > { %149 = vst.msk [vmem:[#allocation2 + $0xf0] sm:$0xff] %vm1581_vm0, %v1028_v0  ;;  %v927_v51 = vpop.eup %926  ;;  %938 = vpow2.f32 %v229_v40  ;;  %v257_v18 = vmul.f32 1.442695, %v196_v10  ;;  %v259_v20 = vmul.f32 1.442695, %v197_v13 }
  0x21   : > { %150 = vst.msk [vmem:[#allocation2 + $0xf8] sm:$0xff] %vm1581_vm0, %v1028_v0  ;;  %v929_v54 = vpop.eup %928  ;;  %940 = vpow2.f32 %v231_v43  ;;  %v261_v22 = vmul.f32 1.442695, %v198_v16 }
  0x22   : > { %152 = vst.msk [vmem:[#allocation2 + $0x108] sm:$0xff] %vm1581_vm0, %v1028_v0  ;;  %v931_v57 = vpop.eup %930  ;;  %942 = vpow2.f32 %v233_v46 }
  0x23   : > { %153 = vst.msk [vmem:[#allocation2 + $0x110] sm:$0xff] %vm1581_vm0, %v1028_v0  ;;  %v933_v60 = vpop.eup %932  ;;  %944 = vpow2.f32 %v235_v49 }
  0x24   : > { %155 = vst.msk [vmem:[#allocation2 + $0x120] sm:$0xff] %vm1581_vm0, %v1028_v0  ;;  %v935_v63 = vpop.eup %934  ;;  %946 = vpow2.f32 %v237_v52 }
  0x25   : > { %156 = vst.msk [vmem:[#allocation2 + $0x128] sm:$0xff] %vm1581_vm0, %v1028_v0  ;;  %v937_v2 = vpop.eup %936  ;;  %948 = vpow2.f32 %v239_v55 }
  0x26   : > { %158 = vst.msk [vmem:[#allocation2 + $0x138] sm:$0xff] %vm1581_vm0, %v1028_v0  ;;  %v939_v5 = vpop.eup %938  ;;  %950 = vpow2.f32 %v241_v58 }
  0x27   : > { %159 = vst.msk [vmem:[#allocation2 + $0x140] sm:$0xff] %vm1581_vm0, %v1028_v0  ;;  %v941_v8 = vpop.eup %940  ;;  %952 = vpow2.f32 %v243_v61 }
  0x28   : > { %161 = vst.msk [vmem:[#allocation2 + $0x150] sm:$0xff] %vm1581_vm0, %v1028_v0  ;;  %v943_v11 = vpop.eup %942 }
  0x29   : > { %162 = vst.msk [vmem:[#allocation2 + $0x158] sm:$0xff] %vm1581_vm0, %v1028_v0  ;;  %v945_v14 = vpop.eup %944 }
  0x2a   : > { %164 = vst.msk [vmem:[#allocation2 + $0x168] sm:$0xff] %vm1581_vm0, %v1028_v0  ;;  %v947_v17 = vpop.eup %946 }
  0x2b   : > { %165 = vst.msk [vmem:[#allocation2 + $0x170] sm:$0xff] %vm1581_vm0, %v1028_v0  ;;  %v949_v19 = vpop.eup %948 }
  0x2c   : > { %295 = vst.msk [vmem:[#allocation3] sm:$0xff] %vm1581_vm0, %v1028_v0  ;;  %v951_v21 = vpop.eup %950 }
  0x2d   : > { %296 = vst.msk [vmem:[#allocation3 + $0x8] sm:$0xff] %vm1581_vm0, %v1028_v0  ;;  %v953_v23 = vpop.eup %952 }
  0x2e   : > { %298 = vst.msk [vmem:[#allocation3 + $0x18] sm:$0xff] %vm1581_vm0, %v1028_v0 }
  0x2f   : > { %299 = vst.msk [vmem:[#allocation3 + $0x20] sm:$0xff] %vm1581_vm0, %v1028_v0 }
  0x30   : > { %301 = vst.msk [vmem:[#allocation3 + $0x30] sm:$0xff] %vm1581_vm0, %v1028_v0 }
  0x31   : > { %302 = vst.msk [vmem:[#allocation3 + $0x38] sm:$0xff] %vm1581_vm0, %v1028_v0 }
  0x32   : > { %304 = vst.msk [vmem:[#allocation3 + $0x48] sm:$0xff] %vm1581_vm0, %v1028_v0 }
  0x33   : > { %305 = vst.msk [vmem:[#allocation3 + $0x50] sm:$0xff] %vm1581_vm0, %v1028_v0 }
  0x34   : > { %307 = vst.msk [vmem:[#allocation3 + $0x60] sm:$0xff] %vm1581_vm0, %v1028_v0 }
  0x35   : > { %308 = vst.msk [vmem:[#allocation3 + $0x68] sm:$0xff] %vm1581_vm0, %v1028_v0 }
  0x36   : > { %310 = vst.msk [vmem:[#allocation3 + $0x78] sm:$0xff] %vm1581_vm0, %v1028_v0 }
  0x37   : > { %311 = vst.msk [vmem:[#allocation3 + $0x80] sm:$0xff] %vm1581_vm0, %v1028_v0 }
  0x38   : > { %313 = vst.msk [vmem:[#allocation3 + $0x90] sm:$0xff] %vm1581_vm0, %v1028_v0 }
  0x39   : > { %314 = vst.msk [vmem:[#allocation3 + $0x98] sm:$0xff] %vm1581_vm0, %v1028_v0 }
  0x3a   : > { %316 = vst.msk [vmem:[#allocation3 + $0xa8] sm:$0xff] %vm1581_vm0, %v1028_v0 }
  0x3b   : > { %317 = vst.msk [vmem:[#allocation3 + $0xb0] sm:$0xff] %vm1581_vm0, %v1028_v0 }
  0x3c   : > { %121 = vst.msk [vmem:[#allocation2 + $0x10] sm:$0x3] %vm120_vm1, %v1028_v0 }
  0x3d   : > { %124 = vst.msk [vmem:[#allocation2 + $0x28] sm:$0x3] %vm120_vm1, %v1028_v0 }
  0x3e   : > { %127 = vst.msk [vmem:[#allocation2 + $0x40] sm:$0x3] %vm120_vm1, %v1028_v0 }
  0x3f   : > { %130 = vst.msk [vmem:[#allocation2 + $0x58] sm:$0x3] %vm120_vm1, %v1028_v0 }
  0x40   : > { %133 = vst.msk [vmem:[#allocation2 + $0x70] sm:$0x3] %vm120_vm1, %v1028_v0 }
  0x41   : > { %136 = vst.msk [vmem:[#allocation2 + $0x88] sm:$0x3] %vm120_vm1, %v1028_v0 }
  0x42   : > { %139 = vst.msk [vmem:[#allocation2 + $0xa0] sm:$0x3] %vm120_vm1, %v1028_v0 }
  0x43   : > { %142 = vst.msk [vmem:[#allocation2 + $0xb8] sm:$0x3] %vm120_vm1, %v1028_v0 }
  0x44   : > { %145 = vst.msk [vmem:[#allocation2 + $0xd0] sm:$0x3] %vm120_vm1, %v1028_v0 }
  0x45   : > { %148 = vst.msk [vmem:[#allocation2 + $0xe8] sm:$0x3] %vm120_vm1, %v1028_v0 }
  0x46   : > { %151 = vst.msk [vmem:[#allocation2 + $0x100] sm:$0x3] %vm120_vm1, %v1028_v0 }
  0x47   : > { %154 = vst.msk [vmem:[#allocation2 + $0x118] sm:$0x3] %vm120_vm1, %v1028_v0 }
  0x48   : > { %157 = vst.msk [vmem:[#allocation2 + $0x130] sm:$0x3] %vm120_vm1, %v1028_v0 }
  0x49   : > { %160 = vst.msk [vmem:[#allocation2 + $0x148] sm:$0x3] %vm120_vm1, %v1028_v0 }
  0x4a   : > { %163 = vst.msk [vmem:[#allocation2 + $0x160] sm:$0x3] %vm120_vm1, %v1028_v0 }
  0x4b   : > { %166 = vst.msk [vmem:[#allocation2 + $0x178] sm:$0x3] %vm120_vm1, %v1028_v0 }
  0x4c   : > { %297 = vst.msk [vmem:[#allocation3 + $0x10] sm:$0x3] %vm120_vm1, %v1028_v0 }
  0x4d   : > { %300 = vst.msk [vmem:[#allocation3 + $0x28] sm:$0x3] %vm120_vm1, %v1028_v0 }
  0x4e   : > { %303 = vst.msk [vmem:[#allocation3 + $0x40] sm:$0x3] %vm120_vm1, %v1028_v0 }
  0x4f   : > { %306 = vst.msk [vmem:[#allocation3 + $0x58] sm:$0x3] %vm120_vm1, %v1028_v0 }
  0x50   : > { %309 = vst.msk [vmem:[#allocation3 + $0x70] sm:$0x3] %vm120_vm1, %v1028_v0 }
  0x51   : > { %312 = vst.msk [vmem:[#allocation3 + $0x88] sm:$0x3] %vm120_vm1, %v1028_v0 }
  0x52   : > { %315 = vst.msk [vmem:[#allocation3 + $0xa0] sm:$0x3] %vm120_vm1, %v1028_v0 }
  0x53   : > { %318 = vst.msk [vmem:[#allocation3 + $0xb8] sm:$0x3] %vm120_vm1, %v1028_v0  ;;  %v245_v0 = vmul.f32 1.442695, %v190_v56 }
  0x54   : > { %263 = vst.msk [vmem:[#allocation2 + $0x1] sm:$0xff] %vm1581_vm0, %v909_v24 }
  0x55   : > { %264 = vst.msk [vmem:[#allocation2 + $0x9] sm:$0xff] %vm1581_vm0, %v911_v27  ;;  %954 = vpow2.f32 %v245_v0 }
  0x56   : > { %265 = vst.msk [vmem:[#allocation2 + $0x19] sm:$0xff] %vm1581_vm0, %v913_v30  ;;  %956 = vpow2.f32 %v247_v3 }
  0x57   : > { %266 = vst.msk [vmem:[#allocation2 + $0x21] sm:$0xff] %vm1581_vm0, %v915_v33  ;;  %958 = vpow2.f32 %v249_v6 }
  0x58   : > { %267 = vst.msk [vmem:[#allocation2 + $0x31] sm:$0xff] %vm1581_vm0, %v917_v36  ;;  %960 = vpow2.f32 %v251_v9 }
  0x59   : > { %268 = vst.msk [vmem:[#allocation2 + $0x39] sm:$0xff] %vm1581_vm0, %v919_v39  ;;  %962 = vpow2.f32 %v253_v12 }
  0x5a   : > { %269 = vst.msk [vmem:[#allocation2 + $0x49] sm:$0xff] %vm1581_vm0, %v921_v42  ;;  %964 = vpow2.f32 %v255_v15 }
  0x5b   : > { %270 = vst.msk [vmem:[#allocation2 + $0x51] sm:$0xff] %vm1581_vm0, %v923_v45  ;;  %v955_v24 = vpop.eup %954  ;;  %966 = vpow2.f32 %v257_v18 }
  0x5c   : > { %271 = vst.msk [vmem:[#allocation2 + $0x61] sm:$0xff] %vm1581_vm0, %v925_v48  ;;  %v957_v25 = vpop.eup %956  ;;  %968 = vpow2.f32 %v259_v20 }
  0x5d   : > { %272 = vst.msk [vmem:[#allocation2 + $0x69] sm:$0xff] %vm1581_vm0, %v927_v51  ;;  %v959_v26 = vpop.eup %958  ;;  %970 = vpow2.f32 %v261_v22 }
  0x5e   : > { %273 = vst.msk [vmem:[#allocation2 + $0x79] sm:$0xff] %vm1581_vm0, %v929_v54  ;;  %v961_v27 = vpop.eup %960 }
  0x5f   : > { %274 = vst.msk [vmem:[#allocation2 + $0x81] sm:$0xff] %vm1581_vm0, %v931_v57  ;;  %v963_v28 = vpop.eup %962 }
  0x60   : > { %275 = vst.msk [vmem:[#allocation2 + $0x91] sm:$0xff] %vm1581_vm0, %v933_v60  ;;  %v965_v29 = vpop.eup %964 }
  0x61   : > { %276 = vst.msk [vmem:[#allocation2 + $0x99] sm:$0xff] %vm1581_vm0, %v935_v63  ;;  %v967_v30 = vpop.eup %966 }
  0x62   : > { %277 = vst.msk [vmem:[#allocation2 + $0xa9] sm:$0xff] %vm1581_vm0, %v937_v2  ;;  %v969_v31 = vpop.eup %968 }
  0x63   : > { %278 = vst.msk [vmem:[#allocation2 + $0xb1] sm:$0xff] %vm1581_vm0, %v939_v5  ;;  %v971_v32 = vpop.eup %970 }
  0x64   : > { %279 = vst.msk [vmem:[#allocation2 + $0xc1] sm:$0xff] %vm1581_vm0, %v941_v8 }
  0x65   : > { %280 = vst.msk [vmem:[#allocation2 + $0xc9] sm:$0xff] %vm1581_vm0, %v943_v11 }
  0x66   : > { %281 = vst.msk [vmem:[#allocation2 + $0xd9] sm:$0xff] %vm1581_vm0, %v945_v14 }
  0x67   : > { %282 = vst.msk [vmem:[#allocation2 + $0xe1] sm:$0xff] %vm1581_vm0, %v947_v17 }
  0x68   : > { %283 = vst.msk [vmem:[#allocation2 + $0xf1] sm:$0xff] %vm1581_vm0, %v949_v19 }
  0x69   : > { %284 = vst.msk [vmem:[#allocation2 + $0xf9] sm:$0xff] %vm1581_vm0, %v951_v21 }
  0x6a   : > { %285 = vst.msk [vmem:[#allocation2 + $0x109] sm:$0xff] %vm1581_vm0, %v953_v23 }
  0x6b   : > { %286 = vst.msk [vmem:[#allocation2 + $0x111] sm:$0xff] %vm1581_vm0, %v955_v24 }
  0x6c   : > { %287 = vst.msk [vmem:[#allocation2 + $0x121] sm:$0xff] %vm1581_vm0, %v957_v25 }
  0x6d   : > { %288 = vst.msk [vmem:[#allocation2 + $0x129] sm:$0xff] %vm1581_vm0, %v959_v26 }
  0x6e   : > { %289 = vst.msk [vmem:[#allocation2 + $0x139] sm:$0xff] %vm1581_vm0, %v961_v27 }
  0x6f   : > { %290 = vst.msk [vmem:[#allocation2 + $0x141] sm:$0xff] %vm1581_vm0, %v963_v28 }
  0x70   : > { %291 = vst.msk [vmem:[#allocation2 + $0x151] sm:$0xff] %vm1581_vm0, %v965_v29 }
  0x71   : > { %292 = vst.msk [vmem:[#allocation2 + $0x159] sm:$0xff] %vm1581_vm0, %v967_v30 }
  0x72   : > { %293 = vst.msk [vmem:[#allocation2 + $0x169] sm:$0xff] %vm1581_vm0, %v969_v31 }
  0x73   : > { %294 = vst.msk [vmem:[#allocation2 + $0x171] sm:$0xff] %vm1581_vm0, %v971_v32 }
  0x74 LB: >> { %s872_s17 = sshll.u32 %s1022_s16, 1  ;;  %vm1580_vm2 = vcmask 26624   ;;  %vm1588_vm3 = vcmask 1041409   ;;  %vm1587_vm4 = vcmask 1042434   ;;  %vm1586_vm5 = vcmask 1043459   ;;  %s495_s19 = smul.u32 24, %s1022_s16  ;;  %s1022_s16 = sphi %s1269_s16, %s324_s16  }
  0x75   : >> { %s1275_s18 = scalar_lea.vmem [#allocation2], %s872_s17  ;;  %vm1585_vm6 = vcmask 1044484   ;;  %vm1584_vm7 = vcmask 1045509   ;;  %vm1583_vm8 = vcmask 1046534   ;;  %vm1582_vm9 = vcmask 1047559   ;;  %s324_s16 = sadd.s32 1, %s1022_s16  }
  0x76   : >> { %s496_s20 = scalar_lea.vmem [#allocation3], %s495_s19  ;;  %p321_p4 = scmp.ge.s32.totalorder %s324_s16, 8  }
  0x77   : > { %s1351_s21 = smov (%p321_p4), 0  }
  0x7a   : >> { %v327_v33 = vld [vmem:[%s1275_s18] sm:$0x7]  ;;  %v328_v34 = vld [vmem:[%s1275_s18 + $0x18] sm:$0x7]  ;;  %v329_v35 = vld [vmem:[%s1275_s18 + $0x30] sm:$0x7] }
  0x7b   : >> { %v330_v36 = vld [vmem:[%s1275_s18 + $0x48] sm:$0x7]  ;;  %v331_v37 = vld [vmem:[%s1275_s18 + $0x60] sm:$0x7]  ;;  %v332_v38 = vld [vmem:[%s1275_s18 + $0x78] sm:$0x7] }
  0x7c   : >> { %v333_v39 = vld [vmem:[%s1275_s18 + $0x90] sm:$0x7]  ;;  %v334_v40 = vld [vmem:[%s1275_s18 + $0xa8] sm:$0x7]  ;;  %v344_v41 = vsel %vm1580_vm2, %v327_v33, 0.0  ;;  %v351_v42 = vsel %vm1580_vm2, %v328_v34, 0.0 }
  0x7d   : >> { %v358_v43 = vsel %vm1580_vm2, %v329_v35, 0.0  ;;  %v365_v44 = vsel %vm1580_vm2, %v330_v36, 0.0  ;;  %v345_v45 = vrot.slane %v344_v41, 4  ;;  %v352_v46 = vrot.slane %v351_v42, 4  ;;  %v335_v9 = vld [vmem:[%s1275_s18 + $0xc0] sm:$0x7] }
  0x7e   : >> { %v359_v47 = vrot.slane %v358_v43, 4  ;;  %v366_v48 = vrot.slane %v365_v44, 4  ;;  %v372_v49 = vsel %vm1580_vm2, %v331_v37, 0.0  ;;  %v379_v50 = vsel %vm1580_vm2, %v332_v38, 0.0  ;;  %v336_v14 = vld [vmem:[%s1275_s18 + $0xd8] sm:$0x7] }
  0x7f   : >> { %v386_v51 = vsel %vm1580_vm2, %v333_v39, 0.0  ;;  %v393_v52 = vsel %vm1580_vm2, %v334_v40, 0.0  ;;  %v346_v53 = vadd.f32 %v345_v45, %v344_v41  ;;  %v353_v54 = vadd.f32 %v352_v46, %v351_v42  ;;  %v337_v18 = vld [vmem:[%s1275_s18 + $0xf0] sm:$0x7]  ;;  %v338_v19 = vld [vmem:[%s1275_s18 + $0x108] sm:$0x7] }
  0x80   : >> { %v360_v55 = vadd.f32 %v359_v47, %v358_v43  ;;  %v367_v56 = vadd.f32 %v366_v48, %v365_v44  ;;  %v373_v57 = vrot.slane %v372_v49, 4  ;;  %v380_v58 = vrot.slane %v379_v50, 4  ;;  %v339_v24 = vld [vmem:[%s1275_s18 + $0x120] sm:$0x7]  ;;  %v340_v25 = vld [vmem:[%s1275_s18 + $0x138] sm:$0x7] }
  0x81   : >> { %v387_v59 = vrot.slane %v386_v51, 4  ;;  %v394_v60 = vrot.slane %v393_v52, 4  ;;  %v347_v61 = vrot.slane %v346_v53, 2  ;;  %v354_v62 = vrot.slane %v353_v54, 2  ;;  %v341_v26 = vld [vmem:[%s1275_s18 + $0x150] sm:$0x7] }
  0x82   : >> { %v361_v63 = vrot.slane %v360_v55, 2  ;;  %v368_v0 = vrot.slane %v367_v56, 2  ;;  %v374_v1 = vadd.f32 %v373_v57, %v372_v49  ;;  %v381_v2 = vadd.f32 %v380_v58, %v379_v50  ;;  %v342_v31 = vld [vmem:[%s1275_s18 + $0x168] sm:$0x7] }
  0x83   : >> { %v388_v3 = vadd.f32 %v387_v59, %v386_v51  ;;  %v395_v4 = vadd.f32 %v394_v60, %v393_v52  ;;  %v348_v5 = vadd.f32 %v347_v61, %v346_v53  ;;  %v355_v6 = vadd.f32 %v354_v62, %v353_v54 }
  0x84   : >> { %v362_v7 = vadd.f32 %v361_v63, %v360_v55  ;;  %v369_v8 = vadd.f32 %v368_v0, %v367_v56  ;;  %v375_v10 = vrot.slane %v374_v1, 2  ;;  %v382_v11 = vrot.slane %v381_v2, 2 }
  0x85   : >> { %v389_v12 = vrot.slane %v388_v3, 2  ;;  %v396_v13 = vrot.slane %v395_v4, 2  ;;  %v349_v15 = vrot.slane %v348_v5, 1  ;;  %v356_v16 = vrot.slane %v355_v6, 1 }
  0x86   : >> { %v363_v17 = vrot.slane %v362_v7, 1  ;;  %v370_v20 = vrot.slane %v369_v8, 1  ;;  %v376_v21 = vadd.f32 %v375_v10, %v374_v1  ;;  %v383_v22 = vadd.f32 %v382_v11, %v381_v2 }
  0x87   : >> { %v1297_v23 = vadd.f32 %v389_v12, %v388_v3  ;;  %v1302_v27 = vadd.f32 %v349_v15, %v348_v5  ;;  %v1304_v28 = vadd.f32 %v356_v16, %v355_v6  ;;  %v1308_v30 = vadd.f32 %v396_v13, %v395_v4 }
  0x88   : >> { %v1306_v29 = vadd.f32 %v363_v17, %v362_v7  ;;  %v400_v32 = vsel %vm1580_vm2, %v335_v9, 0.0  ;;  %v407_v33 = vsel %vm1580_vm2, %v336_v14, 0.0  ;;  %v414_v34 = vsel %vm1580_vm2, %v337_v18, 0.0 }
  0x89   : >> { %v421_v35 = vsel %vm1580_vm2, %v338_v19, 0.0  ;;  %v1315_v36 = vadd.f32 %v370_v20, %v369_v8  ;;  %v377_v37 = vrot.slane %v376_v21, 1  ;;  %v384_v38 = vrot.slane %v383_v22, 1 }
  0x8a   : >> { %v391_v39 = vrot.slane %v1297_v23, 1  ;;  %v401_v40 = vrot.slane %v400_v32, 4  ;;  %v408_v41 = vrot.slane %v407_v33, 4  ;;  %v415_v42 = vrot.slane %v414_v34, 4 }
  0x8b   : >> { %v422_v43 = vrot.slane %v421_v35, 4  ;;  %v428_v44 = vsel %vm1580_vm2, %v339_v24, 0.0  ;;  %v435_v45 = vsel %vm1580_vm2, %v340_v25, 0.0  ;;  %v442_v46 = vsel %vm1580_vm2, %v341_v26, 0.0 }
  0x8c   : >> { %v449_v47 = vsel %vm1580_vm2, %v342_v31, 0.0  ;;  %v402_v48 = vadd.f32 %v401_v40, %v400_v32  ;;  %v409_v49 = vadd.f32 %v408_v41, %v407_v33  ;;  %v416_v50 = vadd.f32 %v415_v42, %v414_v34 }
  0x8d   : >> { %v423_v51 = vadd.f32 %v422_v43, %v421_v35  ;;  %v429_v52 = vrot.slane %v428_v44, 4  ;;  %v436_v53 = vrot.slane %v435_v45, 4  ;;  %v443_v54 = vrot.slane %v442_v46, 4 }
  0x8e   : >> { %v450_v55 = vrot.slane %v449_v47, 4  ;;  %v403_v56 = vrot.slane %v402_v48, 2  ;;  %v410_v57 = vrot.slane %v409_v49, 2  ;;  %v417_v58 = vrot.slane %v416_v50, 2 }
  0x8f   : >> { %v424_v59 = vrot.slane %v423_v51, 2  ;;  %v430_v60 = vadd.f32 %v429_v52, %v428_v44  ;;  %v437_v61 = vadd.f32 %v436_v53, %v435_v45  ;;  %v444_v62 = vadd.f32 %v443_v54, %v442_v46 }
  0x90   : >> { %v451_v63 = vadd.f32 %v450_v55, %v449_v47  ;;  %v404_v0 = vadd.f32 %v403_v56, %v402_v48  ;;  %v411_v1 = vadd.f32 %v410_v57, %v409_v49  ;;  %v418_v2 = vadd.f32 %v417_v58, %v416_v50 }
  0x91   : >> { %v425_v3 = vadd.f32 %v424_v59, %v423_v51  ;;  %v431_v4 = vrot.slane %v430_v60, 2  ;;  %v438_v5 = vrot.slane %v437_v61, 2  ;;  %v445_v6 = vrot.slane %v444_v62, 2 }
  0x92   : >> { %v452_v7 = vrot.slane %v451_v63, 2  ;;  %v405_v8 = vrot.slane %v404_v0, 1  ;;  %v412_v9 = vrot.slane %v411_v1, 1  ;;  %v419_v10 = vrot.slane %v418_v2, 1 }
  0x93   : >> { %v426_v11 = vrot.slane %v425_v3, 1  ;;  %v432_v12 = vadd.f32 %v431_v4, %v430_v60  ;;  %v439_v13 = vadd.f32 %v438_v5, %v437_v61  ;;  %v446_v14 = vadd.f32 %v445_v6, %v444_v62 }
  0x94   : >> { %v453_v15 = vadd.f32 %v452_v7, %v451_v63  ;;  %v378_v16 = vadd.f32 %v377_v37, %v376_v21  ;;  %v385_v17 = vadd.f32 %v384_v38, %v383_v22  ;;  %v398_v18 = vrot.slane %v1308_v30, 1 }
  0x95   : >> { %v406_v19 = vadd.f32 %v405_v8, %v404_v0  ;;  %v413_v20 = vadd.f32 %v412_v9, %v411_v1  ;;  %v420_v24 = vadd.f32 %v419_v10, %v418_v2  ;;  %v433_v25 = vrot.slane %v432_v12, 1 }
  0x96   : >> { %v440_v26 = vrot.slane %v439_v13, 1  ;;  %v447_v31 = vrot.slane %v446_v14, 1  ;;  %v473_v32 = vsel %vm1588_vm3, %v1304_v28, %v1302_v27  ;;  %v392_v33 = vadd.f32 %v391_v39, %v1297_v23 }
  0x97   : >> { %v427_v34 = vadd.f32 %v426_v11, %v425_v3  ;;  %v454_v21 = vrot.slane %v453_v15, 1  ;;  %v399_v22 = vadd.f32 %v398_v18, %v1308_v30  ;;  %v434_v35 = vadd.f32 %v433_v25, %v432_v12 }
  0x98   : >> { %v475_v37 = vsel %vm1587_vm4, %v1306_v29, %v473_v32  ;;  %v441_v38 = vadd.f32 %v440_v26, %v439_v13  ;;  %v486_v27 = vsel %vm1588_vm3, %v413_v20, %v406_v19  ;;  %v448_v28 = vadd.f32 %v447_v31, %v446_v14 }
  0x99   : >> { %v477_v40 = vsel %vm1586_vm5, %v1315_v36, %v475_v37  ;;  %v487_v39 = vsel %vm1587_vm4, %v420_v24, %v486_v27  ;;  %v455_v41 = vadd.f32 %v454_v21, %v453_v15  ;;  %v499_v47 = vlaneseq (%p321_p4) }
  0x9a   : >> { %v479_v23 = vsel %vm1585_vm6, %v378_v16, %v477_v40  ;;  %v488_v42 = vsel %vm1586_vm5, %v427_v34, %v487_v39 }
  0x9b   : >> { %v481_v30 = vsel %vm1584_vm7, %v385_v17, %v479_v23  ;;  %v489_v43 = vsel %vm1585_vm6, %v434_v35, %v488_v42  ;;  %323 = sbr.rel (!%p321_p4) target bundleno = 116 (0x74), region = 72  ;;  %v500_v48 = vshrl.u32 (%p321_p4), %v499_v47, 7 }
  0x9c   : >> { %v483_v29 = vsel %vm1583_vm8, %v392_v33, %v481_v30  ;;  %v490_v44 = vsel %vm1584_vm7, %v441_v38, %v489_v43 }
  0x9d   : >> { %v485_v36 = vsel %vm1582_vm9, %v399_v22, %v483_v29  ;;  %v491_v45 = vsel %vm1583_vm8, %v448_v28, %v490_v44  ;;  %v501_v49 = vmul.u32 (%p321_p4), 2, %v500_v48 }
  0x9e   : >> { %497 = vst.msk [vmem:[%s496_s20 + $0x1] sm:$0xff] %vm1581_vm0, %v485_v36  ;;  %v492_v46 = vsel %vm1582_vm9, %v455_v41, %v491_v45 }
  0x9f   : >> { %498 = vst.msk [vmem:[%s496_s20 + $0x9] sm:$0xff] %vm1581_vm0, %v492_v46  ;;  %v873_v50 = vadd.s32 (%p321_p4), 4294967295, %v501_v49 }
  0xa1   : > { %v503_v51 = vadd.s32 3, %v873_v50  ;;  %vm506_vm10 = vcmp.gt.s32.totalorder %v873_v50, 0 }
  0xa2   : > { %v507_v52 = vsel %vm506_vm10, %v873_v50, 0 }
  0xa3   : > { %vm504_vm11 = vcmp.lt.s32.totalorder %v503_v51, 16 }
  0xa4   : > { %v505_v53 = vsel %vm504_vm11, %v503_v51, 16 }
  0xa5   : > { %v508_v54 = vsub.s32 %v505_v53, %v507_v52 }
  0xa7   : > { %vm509_vm12 = vcmp.gt.s32.totalorder %v508_v54, 0  ;;  %v874_v55 = vcvt.s32.f32 %v508_v54 }
  0xa9   : > { %v1349_v56 = vsel %vm509_vm12, %v874_v55, 0.0 }
  0xaa LB: >> { %s1357_s22 = sshll.u32 %s1026_s21, 1  ;;  %vm1589_vm2 = vcmask 26624   ;;  %s878_s28 = sshll.u32 %s1026_s21, 3  ;;  %s1026_s21 = sphi %s1351_s21, %s517_s21  }
  0xab   : >> { %s877_s23 = sadd.s32 4294967295, %s1357_s22  ;;  %s519_s24 = scalar_lea.vmem [#allocation3], %s1357_s22 }
  0xac   : >> { %v520_v57 = vld [vmem:[%s519_s24] sm:$0x7]  ;;  %v521_v58 = vld [vmem:[%s519_s24 + $0x18] sm:$0x7]  ;;  %v522_v59 = vld [vmem:[%s519_s24 + $0x30] sm:$0x7]  ;;  %s788_s29 = scalar_lea.vmem %s1063_s11, %s878_s28 }
  0xad   : >> { %v523_v60 = vld [vmem:[%s519_s24 + $0x48] sm:$0x7]  ;;  %v524_v61 = vld [vmem:[%s519_s24 + $0x60] sm:$0x7]  ;;  %v525_v62 = vld [vmem:[%s519_s24 + $0x78] sm:$0x7] }
  0xae   : >> { %v526_v63 = vld [vmem:[%s519_s24 + $0x90] sm:$0x7]  ;;  %v527_v0 = vld [vmem:[%s519_s24 + $0xa8] sm:$0x7]  ;;  %v529_v1 = vsel %vm1589_vm2, %v520_v57, 0.0  ;;  %v536_v2 = vsel %vm1589_vm2, %v521_v58, 0.0 }
  0xaf   : >> { %v530_v3 = vrot.slane %v529_v1, 4  ;;  %v537_v4 = vrot.slane %v536_v2, 4  ;;  %v543_v5 = vsel %vm1589_vm2, %v522_v59, 0.0  ;;  %v550_v6 = vsel %vm1589_vm2, %v523_v60, 0.0  ;;  %s586_s25 = sadd.s32 2, %s1357_s22  ;;  %p589_p5 = scmp.gt.s32.totalorder %s877_s23, 0 }
  0xb0   : >> { %v544_v7 = vrot.slane %v543_v5, 4  ;;  %v551_v8 = vrot.slane %v550_v6, 4  ;;  %v557_v9 = vsel %vm1589_vm2, %v524_v61, 0.0  ;;  %v564_v10 = vsel %vm1589_vm2, %v525_v62, 0.0  ;;  %p587_p6 = scmp.lt.s32.totalorder %s586_s25, 16  ;;  %s517_s21 = sadd.s32 1, %s1026_s21  }
  0xb1   : >> { %v531_v11 = vadd.f32 %v530_v3, %v529_v1  ;;  %v538_v12 = vadd.f32 %v537_v4, %v536_v2  ;;  %v558_v13 = vrot.slane %v557_v9, 4  ;;  %v565_v14 = vrot.slane %v564_v10, 4  ;;  %s1629_s23 = smov (!%p589_p5, %s877_s23), 0  ;;  %p514_p8 = scmp.ge.s32.totalorder %s517_s21, 8  }
  0xb2   : >> { %v545_v15 = vadd.f32 %v544_v7, %v543_v5  ;;  %v552_v16 = vadd.f32 %v551_v8, %v550_v6  ;;  %v571_v17 = vsel %vm1589_vm2, %v526_v63, 0.0  ;;  %v578_v18 = vsel %vm1589_vm2, %v527_v0, 0.0  ;;  %s1631_s25 = smov (!%p587_p6, %s586_s25), 16 }
  0xb3   : >> { %v532_v19 = vrot.slane %v531_v11, 2  ;;  %v539_v20 = vrot.slane %v538_v12, 2  ;;  %v559_v24 = vadd.f32 %v558_v13, %v557_v9  ;;  %v566_v25 = vadd.f32 %v565_v14, %v564_v10  ;;  %s591_s26 = ssub.s32 %s1631_s25, %s1629_s23 }
  0xb4   : >> { %v546_v26 = vrot.slane %v545_v15, 2  ;;  %v553_v31 = vrot.slane %v552_v16, 2  ;;  %v572_v32 = vrot.slane %v571_v17, 4  ;;  %p592_p7 = scmp.gt.s32.totalorder %s591_s26, 0  ;;  %v579_v37 = vrot.slane %v578_v18, 4 }
  0xb5   : >> { %v560_v33 = vrot.slane %v559_v24, 2  ;;  %v567_v34 = vrot.slane %v566_v25, 2  ;;  %v533_v21 = vadd.f32 %v532_v19, %v531_v11  ;;  %v540_v22 = vadd.f32 %v539_v20, %v538_v12 }
  0xb6   : >> { %v573_v35 = vadd.f32 %v572_v32, %v571_v17  ;;  %v547_v38 = vadd.f32 %v546_v26, %v545_v15  ;;  %v554_v40 = vadd.f32 %v553_v31, %v552_v16  ;;  %s1633_s26 = smov (!%p592_p7, %s591_s26), 0  ;;  %v1370_v30 = vadd.f32 %v579_v37, %v578_v18 }
  0xb7   : >> { %v561_v27 = vadd.f32 %v560_v33, %v559_v24  ;;  %v568_v28 = vadd.f32 %v567_v34, %v566_v25  ;;  %s594_s27 = scvt.s32.f32 %s1633_s26  ;;  %v534_v39 = vrot.slane %v533_v21, 1  ;;  %v541_v41 = vrot.slane %v540_v22, 1 }
  0xb8   : >> { %v574_v23 = vrot.slane %v573_v35, 2  ;;  %v548_v42 = vrot.slane %v547_v38, 1  ;;  %v555_v29 = vrot.slane %v554_v40, 1  ;;  %v581_v48 = vrot.slane %v1370_v30, 2 }
  0xb9   : >> { %v562_v43 = vrot.slane %v561_v27, 1  ;;  %v595_v36 = vstv %s594_s27  ;;  %v569_v44 = vrot.slane %v568_v28, 1  ;;  %v1377_v47 = vadd.f32 %v534_v39, %v533_v21 }
  0xba   : >> { %v1372_v45 = vadd.f32 %v574_v23, %v573_v35  ;;  %v1375_v46 = vmul.f32 %v1349_v56, %v595_v36  ;;  %v1386_v51 = vadd.f32 %v541_v41, %v540_v22  ;;  %v1388_v52 = vadd.f32 %v548_v42, %v547_v38 }
  0xbb   : >> { %v1390_v53 = vadd.f32 %v555_v29, %v554_v40  ;;  %v1392_v54 = vadd.f32 %v562_v43, %v561_v27  ;;  %v1394_v55 = vadd.f32 %v569_v44, %v568_v28 }
  0xbc   : >> { %v1381_v49 = vrot.slane %v1375_v46, 1  ;;  %v1384_v50 = vrot.slane %v1375_v46, 2  ;;  %v576_v57 = vrot.slane %v1372_v45, 1  ;;  %v1398_v58 = vrot.slane %v1375_v46, 3 }
  0xbd   : >> { %972 = vrcp.f32 %v1375_v46  ;;  %v1402_v59 = vrot.slane %v1375_v46, 4  ;;  %v622_v60 = vand.u32 2147483647, %v1375_v46  ;;  %v624_v61 = vand.u32 2147483648, %v1375_v46 }
  0xbe   : >> { %974 = vrcp.f32 %v1381_v49  ;;  %v1408_v62 = vrot.slane %v1375_v46, 5  ;;  %v637_v63 = vand.u32 2147483647, %v1381_v49  ;;  %v639_v0 = vand.u32 2147483648, %v1381_v49 }
  0xbf   : >> { %976 = vrcp.f32 %v1384_v50  ;;  %v1414_v1 = vrot.slane %v1375_v46, 6  ;;  %v1417_v2 = vrot.slane %v1375_v46, 7  ;;  %v652_v3 = vand.u32 2147483647, %v1384_v50 }
  0xc0   : >> { %v654_v4 = vand.u32 2147483648, %v1384_v50  ;;  %vm618_vm13 = vweird.f32 %v1375_v46  ;;  %vm633_vm14 = vweird.f32 %v1381_v49  ;;  %vm648_vm15 = vweird.f32 %v1384_v50 }
  0xc1   : >> { %978 = vrcp.f32 %v1398_v58  ;;  %vm1425_vm1 = vcmp.eq.f32.partialorder %v622_v60, 8.507059e+37  ;;  %v625_v6 = vor.u32 1.1754944e-38, %v624_v61  ;;  %v667_v7 = vand.u32 2147483647, %v1398_v58 }
  0xc2   : >> { %v669_v8 = vand.u32 2147483648, %v1398_v58  ;;  %980 = vrcp.f32 %v1402_v59  ;;  %vm1432_vm10 = vcmp.eq.f32.partialorder %v637_v63, 8.507059e+37  ;;  %v640_v11 = vor.u32 1.1754944e-38, %v639_v0 }
  0xc3   : >> { %v973_v9 = vpop.eup %972  ;;  %v682_v12 = vand.u32 2147483647, %v1402_v59  ;;  %v684_v13 = vand.u32 2147483648, %v1402_v59  ;;  %vm1440_vm12 = vcmp.eq.f32.partialorder %v652_v3, 8.507059e+37  ;;  %v655_v17 = vor.u32 1.1754944e-38, %v654_v4 }
  0xc4   : >> { %v975_v14 = vpop.eup %974  ;;  %v614_v15 = vmul.f32 %v973_v9, %v1375_v46  ;;  %982 = vrcp.f32 %v1408_v62  ;;  %vm619_vm0 = vweird.f32 %v973_v9  ;;  %v670_v20 = vor.u32 1.1754944e-38, %v669_v8 }
  0xc5   : >> { %v977_v18 = vpop.eup %976  ;;  %v629_v19 = vmul.f32 %v975_v14, %v1381_v49  ;;  %vm634_vm9 = vweird.f32 %v975_v14  ;;  %vm1448_vm7 = vcmp.eq.f32.partialorder %v667_v7, 8.507059e+37  ;;  %v685_v31 = vor.u32 1.1754944e-38, %v684_v13  ;;  %vm1464_vm4 = vmor %vm618_vm13, %vm619_vm0 }
  0xc6   : >> { %v615_v24 = vsub.f32 1.0, %v614_v15  ;;  %v644_v25 = vmul.f32 %v977_v18, %v1384_v50  ;;  %vm649_vm8 = vweird.f32 %v977_v18  ;;  %vm1452_vm6 = vcmp.eq.f32.partialorder %v682_v12, 8.507059e+37  ;;  %vm1472_vm11 = vmor %vm633_vm14, %vm634_vm9 }
  0xc7   : >> { %v979_v32 = vpop.eup %978  ;;  %v630_v33 = vsub.f32 1.0, %v629_v19  ;;  %v697_v21 = vand.u32 2147483647, %v1408_v62  ;;  %v699_v22 = vand.u32 2147483648, %v1408_v62  ;;  %984 = vrcp.f32 %v1414_v1  ;;  %vm1483_vm13 = vmor %vm648_vm15, %vm649_vm8 }
  0xc8   : >> { %v981_v35 = vpop.eup %980  ;;  %v616_v37 = vmul.f32 %v973_v9, %v615_v24  ;;  %v645_v38 = vsub.f32 1.0, %v644_v25  ;;  %v659_v40 = vmul.f32 %v979_v32, %v1398_v58  ;;  %vm693_vm5 = vweird.f32 %v1408_v62 }
  0xc9   : >> { %v631_v28 = vmul.f32 %v975_v14, %v630_v33  ;;  %vm664_vm3 = vweird.f32 %v979_v32  ;;  %v674_v23 = vmul.f32 %v981_v35, %v1402_v59  ;;  %vm679_vm2 = vweird.f32 %v981_v35 }
  0xca   : >> { %v983_v39 = vpop.eup %982  ;;  %v617_v41 = vadd.f32 %v973_v9, %v616_v37  ;;  %v646_v29 = vmul.f32 %v977_v18, %v645_v38  ;;  %v660_v43 = vsub.f32 1.0, %v659_v40  ;;  %vm1476_vm0 = vcmp.eq.f32.partialorder %v697_v21, 8.507059e+37 }
  0xcb   : >> { %v632_v44 = vadd.f32 %v975_v14, %v631_v28  ;;  %v675_v60 = vsub.f32 1.0, %v674_v23  ;;  %v689_v49 = vmul.f32 %v983_v39, %v1408_v62  ;;  %v700_v61 = vor.u32 1.1754944e-38, %v699_v22 }
  0xcc   : >> { %v621_v63 = vsel %vm1464_vm4, %v973_v9, %v617_v41  ;;  %v647_v0 = vadd.f32 %v977_v18, %v646_v29  ;;  %v661_v3 = vmul.f32 %v979_v32, %v660_v43  ;;  %vm694_vm9 = vweird.f32 %v983_v39 }
  0xcd   : >> { %v985_v4 = vpop.eup %984  ;;  %v626_v7 = vsel %vm1425_vm1, %v625_v6, %v621_v63  ;;  %v636_v50 = vsel %vm1472_vm11, %v975_v14, %v632_v44  ;;  %vm1608_vm8 = vweird.f32 %v1398_v58  ;;  %v676_v12 = vmul.f32 %v981_v35, %v675_v60 }
  0xce   : >> { %vm1497_vm14 = vmor %vm1608_vm8, %vm664_vm3  ;;  %v690_v13 = vsub.f32 1.0, %v689_v49  ;;  %v641_v9 = vsel %vm1432_vm10, %v640_v11, %v636_v50  ;;  %v651_v15 = vsel %vm1483_vm13, %v977_v18, %v647_v0  ;;  %v662_v5 = vadd.f32 %v979_v32, %v661_v3 }
  0xcf   : >> { %vm1611_vm4 = vweird.f32 %v1402_v59  ;;  %vm708_vm3 = vweird.f32 %v1414_v1  ;;  %v627_v58 = vmul.f32 %v626_v7, %v1377_v47  ;;  %v656_v14 = vsel %vm1440_vm12, %v655_v17, %v651_v15 }
  0xd0   : >> { %vm1508_vm15 = vmor %vm1611_vm4, %vm679_vm2  ;;  %v677_v10 = vadd.f32 %v981_v35, %v676_v12  ;;  %v691_v11 = vmul.f32 %v983_v39, %v690_v13  ;;  %v642_v19 = vmul.f32 %v641_v9, %v1386_v51  ;;  %v657_v18 = vmul.f32 %v656_v14, %v1388_v52 }
  0xd1   : >> { %v666_v59 = vsel %vm1497_vm14, %v979_v32, %v662_v5  ;;  %vm1523_vm2 = vmor %vm693_vm5, %vm694_vm9  ;;  %v704_v47 = vmul.f32 %v985_v4, %v1414_v1  ;;  %vm709_vm1 = vweird.f32 %v985_v4  ;;  %v712_v62 = vand.u32 2147483647, %v1414_v1 }
  0xd2   : >> { %v671_v16 = vsel %vm1448_vm7, %v670_v20, %v666_v59  ;;  %v681_v51 = vsel %vm1508_vm15, %v981_v35, %v677_v10  ;;  %v692_v17 = vadd.f32 %v983_v39, %v691_v11  ;;  %v714_v32 = vand.u32 2147483648, %v1414_v1  ;;  %vm710_vm5 = vmor %vm708_vm3, %vm709_vm1 }
  0xd3   : >> { %v686_v52 = vsel %vm1452_vm6, %v685_v31, %v681_v51  ;;  %v705_v25 = vsub.f32 1.0, %v704_v47  ;;  %v672_v33 = vmul.f32 %v671_v16, %v1390_v53  ;;  %986 = vrcp.f32 %v1417_v2 }
  0xd4   : >> { %v696_v21 = vsel %vm1523_vm2, %v983_v39, %v692_v17  ;;  %v582_v20 = vadd.f32 %v581_v48, %v1370_v30  ;;  %v687_v26 = vmul.f32 %v686_v52, %v1392_v54  ;;  %v577_v22 = vadd.f32 %v576_v57, %v1372_v45 }
  0xd5   : >> { %v701_v31 = vsel %vm1476_vm0, %v700_v61, %v696_v21  ;;  %v706_v34 = vmul.f32 %v985_v4, %v705_v25  ;;  %v715_v35 = vor.u32 1.1754944e-38, %v714_v32  ;;  %v733_v37 = vmax.f32 %v627_v58, 1e-30 }
  0xd6   : >> { %v702_v53 = vmul.f32 %v701_v31, %v1394_v55  ;;  %vm713_vm6 = vcmp.eq.f32.partialorder %v712_v62, 8.507059e+37  ;;  %v734_v30 = vmax.f32 %v642_v19, 1e-30  ;;  %v735_v48 = vmax.f32 %v657_v18, 1e-30 }
  0xd7   : >> { %v707_v38 = vadd.f32 %v985_v4, %v706_v34  ;;  %v736_v54 = vmax.f32 %v672_v33, 1e-30  ;;  %v737_v27 = vmax.f32 %v687_v26, 1e-30  ;;  %988 = vlog2.f32 %v733_v37 }
  0xd8   : >> { %v738_v39 = vmax.f32 %v702_v53, 1e-30  ;;  %990 = vlog2.f32 %v734_v30  ;;  %v583_v45 = vrot.slane %v582_v20, 1  ;;  %vm723_vm7 = vweird.f32 %v1417_v2 }
  0xd9   : >> { %v711_v40 = vsel %vm710_vm5, %v985_v4, %v707_v38  ;;  %v987_v28 = vpop.eup %986  ;;  %992 = vlog2.f32 %v735_v48  ;;  %v727_v1 = vand.u32 2147483647, %v1417_v2  ;;  %v729_v41 = vand.u32 2147483648, %v1417_v2 }
  0xda   : >> { %v716_v23 = vsel %vm713_vm6, %v715_v35, %v711_v40  ;;  %v719_v55 = vmul.f32 %v987_v28, %v1417_v2  ;;  %994 = vlog2.f32 %v736_v54  ;;  %vm724_vm10 = vweird.f32 %v987_v28 }
  0xdb   : >> { %v717_v57 = vmul.f32 %v716_v23, %v577_v22  ;;  %996 = vlog2.f32 %v737_v27  ;;  %v584_v46 = vadd.f32 %v583_v45, %v582_v20  ;;  %vm1556_vm11 = vmor %vm723_vm7, %vm724_vm10  ;;  %v730_v49 = vor.u32 1.1754944e-38, %v729_v41 }
  0xdc   : >> { %v720_v42 = vsub.f32 1.0, %v719_v55  ;;  %998 = vlog2.f32 %v738_v39  ;;  %vm728_vm12 = vcmp.eq.f32.partialorder %v727_v1, 8.507059e+37  ;;  %vm1618_vm0 = vcmask 1041409  }
  0xdd   : >> { %v739_v29 = vmax.f32 %v717_v57, 1e-30  ;;  %v989_v43 = vpop.eup %988  ;;  %vm1619_vm13 = vcmask 1042434   ;;  %vm1620_vm9 = vcmask 1043459   ;;  %vm1621_vm8 = vcmask 1044484  }
  0xde   : >> { %v721_v36 = vmul.f32 %v987_v28, %v720_v42  ;;  %v991_v44 = vpop.eup %990  ;;  %v742_v2 = vmul.f32 0.6931472, %v989_v43  ;;  %vm1622_vm14 = vcmask 1045509   ;;  %vm1623_vm4 = vcmask 1046534  }
  0xdf   : >> { %1000 = vlog2.f32 %v739_v29  ;;  %v993_v61 = vpop.eup %992  ;;  %v744_v0 = vmul.f32 0.6931472, %v991_v44  ;;  %vm1624_vm15 = vcmask 1047559   ;;  %vm1625_vm3 = vcmask 31744  }
  0xe0   : >> { %v722_v63 = vadd.f32 %v987_v28, %v721_v36  ;;  %v995_v3 = vpop.eup %994  ;;  %v746_v4 = vmul.f32 0.6931472, %v993_v61 }
  0xe1   : >> { %v997_v7 = vpop.eup %996  ;;  %v748_v8 = vmul.f32 0.6931472, %v995_v3  ;;  %v765_v12 = vrot.slane %v744_v0, 7 }
  0xe2   : >> { %v726_v50 = vsel %vm1556_vm11, %v987_v28, %v722_v63  ;;  %v999_v13 = vpop.eup %998  ;;  %v750_v15 = vmul.f32 0.6931472, %v997_v7  ;;  %v768_v5 = vrot.slane %v746_v4, 6 }
  0xe3   : >> { %v731_v9 = vsel %vm728_vm12, %v730_v49, %v726_v50  ;;  %v767_v58 = vsel %vm1618_vm0, %v765_v12, %v742_v2  ;;  %v771_v14 = vrot.slane %v748_v8, 5  ;;  %v752_v11 = vmul.f32 0.6931472, %v999_v13 }
  0xe4   : >> { %v732_v6 = vmul.f32 %v731_v9, %v584_v46  ;;  %v770_v19 = vsel %vm1619_vm13, %v768_v5, %v767_v58  ;;  %v774_v59 = vrot.slane %v750_v15, 4 }
  0xe5   : >> { %v1001_v10 = vpop.eup %1000  ;;  %v773_v24 = vsel %vm1620_vm9, %v771_v14, %v770_v19  ;;  %v777_v16 = vrot.slane %v752_v11, 3 }
  0xe6   : >> { %v740_v18 = vmax.f32 %v732_v6, 1e-30  ;;  %v754_v47 = vmul.f32 0.6931472, %v1001_v10  ;;  %v776_v51 = vsel %vm1621_vm8, %v774_v59, %v773_v24 }
  0xe7   : >> { %v779_v52 = vsel %vm1622_vm14, %v777_v16, %v776_v51 }
  0xe8   : >> { %1002 = vlog2.f32 %v740_v18  ;;  %v780_v17 = vrot.slane %v754_v47, 2 }
  0xea   : >> { %v782_v32 = vsel %vm1623_vm4, %v780_v17, %v779_v52 }
  0xee   : >> { %v1003_v25 = vpop.eup %1002 }
  0xef   : >> { %v756_v62 = vmul.f32 0.6931472, %v1003_v25 }
  0xf0   : > { %516 = sbr.rel (!%p514_p8) target bundleno = 170 (0xaa), region = 83 }
  0xf1   : >> { %v783_v33 = vrot.slane %v756_v62, 1 }
  0xf3   : >> { %v785_v21 = vsel %vm1624_vm15, %v783_v33, %v782_v32 }
  0xf4   : >> { %789 = vst.msk [vmem:[%s788_s29] sm:$0xff] %vm1625_vm3, %v785_v21 }
  0xf5 PF: > { %s11_s6 = sadd.s32 1, %s1018_s6  }
  0xf6   : > { %p8_p9 = scmp.ge.s32.totalorder %s11_s6, 10  }
  0xf8   :  { %10 = sbr.rel (!%p8_p9) target bundleno = 1 (0x1), region = 94 }

</bundles_post_ra>
